<compile_context>
chip_gen: v5e
topology: v5e:2x2
jax: 0.10.0
libtpu: 0.0.40
codegen_flags: <defaults>
</compile_context>

<pallas_src>
import functools

import jax
import jax.numpy as jnp
from jax.experimental import pallas as pl
from jax.experimental.pallas import tpu as pltpu

LANE = 128


def _round_up(n, m=LANE):
    return ((n + m - 1) // m) * m


# ----------------------------------------------------------------------------
# Kernel
# ----------------------------------------------------------------------------
def network_kernel(x_ref,
                   w1_ref, b1_ref, w2_ref, b2_ref,      # fea_net (padded)
                   wac1_ref, bac1_ref,                  # fused actor1 | critic1
                   wout_ref, bout_ref,                  # fused actor2 | critic2
                   out_ref, *, out_dim):
    f32 = jnp.float32

    # ---- fea_net: Linear -> ReLU -> Linear -> ReLU ----
    h1 = jnp.dot(x_ref[...], w1_ref[...], preferred_element_type=f32) + b1_ref[...]
    h1 = jnp.maximum(h1, 0.0).astype(jnp.bfloat16)
    fea = jnp.dot(h1, w2_ref[...], preferred_element_type=f32) + b2_ref[...]
    fea = jnp.maximum(fea, 0.0).astype(jnp.bfloat16)

    # ---- fused actor-1 | critic-1: one [B, 2*HID_P] matmul + bias + ReLU ----
    hac = jnp.dot(fea, wac1_ref[...], preferred_element_type=f32) + bac1_ref[...]
    hac = jnp.maximum(hac, 0.0).astype(jnp.bfloat16)

    # ---- fused actor-2 | critic-2 into one lane-dense [B, OUT_P] slab ----
    # lanes [0, out_dim) -> actor logits ; lane out_dim -> critic value
    raw = jnp.dot(hac, wout_ref[...], preferred_element_type=f32) + bout_ref[...]

    lane = jax.lax.broadcasted_iota(jnp.int32, raw.shape, 1)
    is_logit = lane < out_dim

    # masked softmax over the logit lanes only
    logits = jnp.where(is_logit, raw, -1e30)
    m = jnp.max(logits, axis=-1, keepdims=True)
    e = jnp.exp(logits - m)
    inv = pl.reciprocal(jnp.sum(e, axis=-1, keepdims=True), approx=True)
    probs = e * inv

    # probs in the logit lanes, raw value (and zeros) everywhere else.
    out_ref[...] = jnp.where(is_logit, probs, raw)


# ----------------------------------------------------------------------------
# Wrapper
# ----------------------------------------------------------------------------
def network_forward(x, packed, with_value=True):
    """x: [B, in_dim] float32. packed: dict from pack_params()."""
    B = x.shape[0]
    out_dim = packed["out_dim"]
    in_p = packed["w1"].shape[0]
    out_p = packed["wout"].shape[1]

    # zero-pad x lanes to 128 and cast to bf16 (halves input DMA bytes)
    x_p = jnp.zeros((B, in_p), jnp.bfloat16).at[:, : x.shape[1]].set(
        x.astype(jnp.bfloat16))

    args = (
        x_p,
        packed["w1"], packed["b1"], packed["w2"], packed["b2"],
        packed["wac1"], packed["bac1"], packed["wout"], packed["bout"],
    )

    vmem = pl.BlockSpec(memory_space=pltpu.MemorySpace.VMEM)
    out = pl.pallas_call(
        functools.partial(network_kernel, out_dim=out_dim),
        in_specs=[vmem] * len(args),
        out_specs=vmem,
        out_shape=jax.ShapeDtypeStruct((B, out_p), jnp.float32),
    )(*args)

    probs = out[:, :out_dim]
    if not with_value:
        return probs                       # Categorical(probs) parameter
    value = out[:, out_dim:out_dim + 1]
    return probs, value


# ----------------------------------------------------------------------------
# Parameter construction / packing
# ----------------------------------------------------------------------------
def init_params(key, in_dim, hid_dim, out_dim):
    """Deterministic init mimicking nn.Linear; weights stored [in, out]."""
    def linear(k, fan_in, fan_out):
        kw, kb = jax.random.split(k)
        bound = 1.0 / jnp.sqrt(fan_in)
        w = jax.random.uniform(kw, (fan_in, fan_out), jnp.float32, -bound, bound)
        b = jax.random.uniform(kb, (fan_out,), jnp.float32, -bound, bound)
        return w, b

    keys = jax.random.split(key, 6)
    p = {}
    p["w1"], p["b1"] = linear(keys[0], in_dim, hid_dim)
    p["w2"], p["b2"] = linear(keys[1], hid_dim, hid_dim)
    p["wa1"], p["ba1"] = linear(keys[2], hid_dim, hid_dim)
    p["wa2"], p["ba2"] = linear(keys[3], hid_dim, out_dim)
    p["wc1"], p["bc1"] = linear(keys[4], hid_dim, hid_dim)
    p["wc2"], p["bc2"] = linear(keys[5], hid_dim, 1)
    return p


def pack_params(p, in_dim, hid_dim, out_dim):
    """Zero-pad lane dims to 128, fuse actor/critic layers, cast weights bf16."""
    in_p = _round_up(in_dim)
    hid_p = _round_up(hid_dim)
    out_p = _round_up(out_dim + 1)        # logits + value lane, padded to 128
    wdt, bdt = jnp.bfloat16, jnp.float32

    def pad_w(w, rows, cols):
        return jnp.zeros((rows, cols), wdt).at[: w.shape[0], : w.shape[1]].set(
            w.astype(wdt))

    def pad_b(b, cols):
        return jnp.zeros((1, cols), bdt).at[0, : b.shape[0]].set(b.astype(bdt))

    packed = {
        "out_dim": out_dim,
        "w1": pad_w(p["w1"], in_p, hid_p), "b1": pad_b(p["b1"], hid_p),
        "w2": pad_w(p["w2"], hid_p, hid_p), "b2": pad_b(p["b2"], hid_p),
    }

    # actor-1 | critic-1 concatenated along lanes, each half padded to hid_p
    wac1 = jnp.zeros((hid_p, 2 * hid_p), wdt)
    wac1 = wac1.at[:hid_dim, :hid_dim].set(p["wa1"].astype(wdt))
    wac1 = wac1.at[:hid_dim, hid_p:hid_p + hid_dim].set(p["wc1"].astype(wdt))
    bac1 = jnp.zeros((1, 2 * hid_p), bdt)
    bac1 = bac1.at[0, :hid_dim].set(p["ba1"])
    bac1 = bac1.at[0, hid_p:hid_p + hid_dim].set(p["bc1"])

    # actor-2 | critic-2 fused into one lane-dense output projection:
    #   rows [0, hid_p)        (a1 half) -> logits in lanes [0, out_dim)
    #   rows [hid_p, 2*hid_p)  (c1 half) -> value  in lane  out_dim
    wout = jnp.zeros((2 * hid_p, out_p), wdt)
    wout = wout.at[:hid_dim, :out_dim].set(p["wa2"].astype(wdt))
    wout = wout.at[hid_p:hid_p + hid_dim, out_dim].set(p["wc2"][:, 0].astype(wdt))
    bout = jnp.zeros((1, out_p), bdt)
    bout = bout.at[0, :out_dim].set(p["ba2"])
    bout = bout.at[0, out_dim].set(p["bc2"][0])

    packed.update({"wac1": wac1, "bac1": bac1, "wout": wout, "bout": bout})
    return packed


# ----------------------------------------------------------------------------
# Pure-JAX f32 reference (matches the PyTorch module exactly)
# ----------------------------------------------------------------------------
def reference_forward(x, p):
    relu = lambda t: jnp.maximum(t, 0.0)
    fea = relu(relu(x @ p["w1"] + p["b1"]) @ p["w2"] + p["b2"])
    logits = relu(fea @ p["wa1"] + p["ba1"]) @ p["wa2"] + p["ba2"]
    probs = jax.nn.softmax(logits, axis=-1)
    value = relu(fea @ p["wc1"] + p["bc1"]) @ p["wc2"] + p["bc2"]
    return probs, value


if __name__ == "__main__":
    B, IN_DIM, HID_DIM, OUT_DIM = 8, 16, 32, 8

    key = jax.random.PRNGKey(0)
    kx, kp = jax.random.split(key)
    x = jax.random.normal(kx, (B, IN_DIM), jnp.float32)
    params = init_params(kp, IN_DIM, HID_DIM, OUT_DIM)
    packed = pack_params(params, IN_DIM, HID_DIM, OUT_DIM)

    probs, value = network_forward(x, packed)
    jax.block_until_ready((probs, value))

    ref_probs, ref_value = reference_forward(x, params)
    assert probs.shape == (B, OUT_DIM) and value.shape == (B, 1)
    # bf16 matmul inputs + approx reciprocal -> compare with mixed-precision tol
    assert jnp.allclose(probs, ref_probs, atol=2e-2, rtol=2e-2)
    assert jnp.allclose(value, ref_value, atol=2e-2, rtol=2e-2)
    assert jnp.all(jnp.abs(jnp.sum(probs, axis=-1) - 1.0) < 5e-3)
    # Categorical(probs) has no tensor compute; the kernel returns its
    # probability parameter.
    print("KERNEL_OK")
</pallas_src>

<mosaic_0001>
module attributes {stable_mosaic.version = 11 : i64} {
  func.func @network_kernel(%arg0: memref<8x128xbf16, #tpu.memory_space<vmem>>, %arg1: memref<128x128xbf16, #tpu.memory_space<vmem>>, %arg2: memref<1x128xf32, #tpu.memory_space<vmem>>, %arg3: memref<128x128xbf16, #tpu.memory_space<vmem>>, %arg4: memref<1x128xf32, #tpu.memory_space<vmem>>, %arg5: memref<128x256xbf16, #tpu.memory_space<vmem>>, %arg6: memref<1x256xf32, #tpu.memory_space<vmem>>, %arg7: memref<256x128xbf16, #tpu.memory_space<vmem>>, %arg8: memref<1x128xf32, #tpu.memory_space<vmem>>, %arg9: memref<8x128xf32, #tpu.memory_space<vmem>>) attributes {dimension_semantics = [], scalar_prefetch = 0 : i64, scratch_operands = 0 : i64, tpu.core_type = #tpu.core_type<tc>} {
    %c0 = arith.constant 0 : index
    %c0_0 = arith.constant 0 : index
    %0 = vector.load %arg0[%c0, %c0_0] : memref<8x128xbf16, #tpu.memory_space<vmem>>, vector<8x128xbf16>
    %c0_1 = arith.constant 0 : index
    %c0_2 = arith.constant 0 : index
    %1 = vector.load %arg1[%c0_1, %c0_2] : memref<128x128xbf16, #tpu.memory_space<vmem>>, vector<128x128xbf16>
    %cst = arith.constant dense<0.000000e+00> : vector<8x128xf32>
    %2 = tpu.matmul %0, %1, %cst {dimension_numbers = #tpu.dot_dimension_numbers<[1], [0], [0], [1], [0, 0, 1, 1], [], []>} : vector<8x128xbf16>, vector<128x128xbf16>, vector<8x128xf32> -> vector<8x128xf32>
    %c0_3 = arith.constant 0 : index
    %c0_4 = arith.constant 0 : index
    %3 = vector.load %arg2[%c0_3, %c0_4] : memref<1x128xf32, #tpu.memory_space<vmem>>, vector<1x128xf32>
    %4 = vector.broadcast %3 : vector<1x128xf32> to vector<8x128xf32>
    %5 = arith.addf %2, %4 : vector<8x128xf32>
    %cst_5 = arith.constant 0.000000e+00 : f32
    %6 = vector.broadcast %cst_5 : f32 to vector<8x128xf32>
    %7 = arith.maximumf %5, %6 : vector<8x128xf32>
    %8 = arith.truncf %7 : vector<8x128xf32> to vector<8x128xbf16>
    %c0_6 = arith.constant 0 : index
    %c0_7 = arith.constant 0 : index
    %9 = vector.load %arg3[%c0_6, %c0_7] : memref<128x128xbf16, #tpu.memory_space<vmem>>, vector<128x128xbf16>
    %cst_8 = arith.constant dense<0.000000e+00> : vector<8x128xf32>
    %10 = tpu.matmul %8, %9, %cst_8 {dimension_numbers = #tpu.dot_dimension_numbers<[1], [0], [0], [1], [0, 0, 1, 1], [], []>} : vector<8x128xbf16>, vector<128x128xbf16>, vector<8x128xf32> -> vector<8x128xf32>
    %c0_9 = arith.constant 0 : index
    %c0_10 = arith.constant 0 : index
    %11 = vector.load %arg4[%c0_9, %c0_10] : memref<1x128xf32, #tpu.memory_space<vmem>>, vector<1x128xf32>
    %12 = vector.broadcast %11 : vector<1x128xf32> to vector<8x128xf32>
    %13 = arith.addf %10, %12 : vector<8x128xf32>
    %cst_11 = arith.constant 0.000000e+00 : f32
    %14 = vector.broadcast %cst_11 : f32 to vector<8x128xf32>
    %15 = arith.maximumf %13, %14 : vector<8x128xf32>
    %16 = arith.truncf %15 : vector<8x128xf32> to vector<8x128xbf16>
    %c0_12 = arith.constant 0 : index
    %c0_13 = arith.constant 0 : index
    %17 = vector.load %arg5[%c0_12, %c0_13] : memref<128x256xbf16, #tpu.memory_space<vmem>>, vector<128x256xbf16>
    %cst_14 = arith.constant dense<0.000000e+00> : vector<8x256xf32>
    %18 = tpu.matmul %16, %17, %cst_14 {dimension_numbers = #tpu.dot_dimension_numbers<[1], [0], [0], [1], [0, 0, 1, 1], [], []>} : vector<8x128xbf16>, vector<128x256xbf16>, vector<8x256xf32> -> vector<8x256xf32>
    %c0_15 = arith.constant 0 : index
    %c0_16 = arith.constant 0 : index
    %19 = vector.load %arg6[%c0_15, %c0_16] : memref<1x256xf32, #tpu.memory_space<vmem>>, vector<1x256xf32>
    %20 = vector.broadcast %19 : vector<1x256xf32> to vector<8x256xf32>
    %21 = arith.addf %18, %20 : vector<8x256xf32>
    %cst_17 = arith.constant 0.000000e+00 : f32
    %22 = vector.broadcast %cst_17 : f32 to vector<8x256xf32>
    %23 = arith.maximumf %21, %22 : vector<8x256xf32>
    %24 = arith.truncf %23 : vector<8x256xf32> to vector<8x256xbf16>
    %c0_18 = arith.constant 0 : index
    %c0_19 = arith.constant 0 : index
    %25 = vector.load %arg7[%c0_18, %c0_19] : memref<256x128xbf16, #tpu.memory_space<vmem>>, vector<256x128xbf16>
    %cst_20 = arith.constant dense<0.000000e+00> : vector<8x128xf32>
    %26 = tpu.matmul %24, %25, %cst_20 {dimension_numbers = #tpu.dot_dimension_numbers<[1], [0], [0], [1], [0, 0, 1, 1], [], []>} : vector<8x256xbf16>, vector<256x128xbf16>, vector<8x128xf32> -> vector<8x128xf32>
    %c0_21 = arith.constant 0 : index
    %c0_22 = arith.constant 0 : index
    %27 = vector.load %arg8[%c0_21, %c0_22] : memref<1x128xf32, #tpu.memory_space<vmem>>, vector<1x128xf32>
    %28 = vector.broadcast %27 : vector<1x128xf32> to vector<8x128xf32>
    %29 = arith.addf %26, %28 : vector<8x128xf32>
    %30 = tpu.iota {dimensions = array<i32: 1>} : vector<8x128xi32>
    %c8_i32 = arith.constant 8 : i32
    %31 = vector.broadcast %c8_i32 : i32 to vector<8x128xi32>
    %32 = arith.cmpi slt, %30, %31 : vector<8x128xi32>
    %cst_23 = arith.constant -1.000000e+30 : f32
    %33 = vector.broadcast %cst_23 : f32 to vector<8x128xf32>
    %34 = arith.select %32, %29, %33 : vector<8x128xi1>, vector<8x128xf32>
    %cst_24 = arith.constant dense<0xFF800000> : vector<8xf32>
    %35 = vector.multi_reduction <maximumf>, %34, %cst_24 [1] : vector<8x128xf32> to vector<8xf32>
    %36 = vector.shape_cast %35 : vector<8xf32> to vector<8x1xf32>
    %37 = vector.broadcast %36 : vector<8x1xf32> to vector<8x128xf32>
    %38 = arith.subf %34, %37 : vector<8x128xf32>
    %39 = math.exp %38 : vector<8x128xf32>
    %cst_25 = arith.constant dense<0.000000e+00> : vector<8xf32>
    %40 = vector.multi_reduction <add>, %39, %cst_25 [1] : vector<8x128xf32> to vector<8xf32>
    %41 = vector.shape_cast %40 : vector<8xf32> to vector<8x1xf32>
    %42 = tpu.reciprocal %41 {approx = true} : vector<8x1xf32> -> vector<8x1xf32>
    %43 = vector.broadcast %42 : vector<8x1xf32> to vector<8x128xf32>
    %44 = arith.mulf %39, %43 : vector<8x128xf32>
    %45 = arith.select %32, %44, %29 : vector<8x128xi1>, vector<8x128xf32>
    %c0_26 = arith.constant 0 : index
    %c0_27 = arith.constant 0 : index
    %46 = vector.load %arg9[%c0_26, %c0_27] : memref<8x128xf32, #tpu.memory_space<vmem>>, vector<8x128xf32>
    tpu.vector_store %arg9[%c0_26, %c0_27], %45 {strides = array<i32>} : memref<8x128xf32, #tpu.memory_space<vmem>>, vector<8x128xf32>,
    return
  }
}

</mosaic_0001>

<bundles_post_ra>
// kernel: tpu_custom_call.1
= control target key start
LH: loop header
LB: loop body
LE: loop exit
PB: predicated region body
PF: predicated region fallthrough
CT: control target
= control target key end

     0   :  { %14 = vsyncpa [#allocation3], 0  ;;  %s1153_s0 = inlined_call_operand.hbm [shape: bf16[8,128], index: 0, kind: input, shape index: {}]   ;;  %s1154_s1 = inlined_call_operand.hbm [shape: bf16[128,128], index: 1, kind: input, shape index: {}]   ;;  %s1155_s2 = inlined_call_operand.vmem [shape: f32[1,128], index: 2, kind: input, shape index: {}]   ;;  %s1156_s3 = inlined_call_operand.hbm [shape: bf16[128,128], index: 3, kind: input, shape index: {}]   ;;  %s1157_s4 = inlined_call_operand.hbm [shape: f32[1,128], index: 4, kind: input, shape index: {}]   ;;  %s1158_s5 = inlined_call_operand.hbm [shape: bf16[128,256], index: 5, kind: input, shape index: {}]   ;;  %s1159_s6 = inlined_call_operand.vmem [shape: f32[1,256], index: 6, kind: input, shape index: {}]   ;;  %s1160_s7 = inlined_call_operand.hbm [shape: bf16[256,128], index: 7, kind: input, shape index: {}]   ;;  %s1161_s8 = inlined_call_operand.vmem [shape: f32[1,128], index: 8, kind: input, shape index: {}]   ;;  %s1162_s9 = inlined_call_operand.hbm [shape: f32[8,128], index: 9, kind: output, shape index: {}]  }
   0x1   :  { %15 = vsyncpa [#allocation6], 0 }
   0x2   :  { %16 = vsyncpa [#allocation9], 0 }
   0x3   :  { %17 = vsyncpa [#allocation12], 0  ;;  %s34_s11 = sshll.u32 %s1154_s1, 4  ;;  %s35_s11 = int_to_ptr.hbm [resolvable:$true] %s34_s11 }
   0x4   :  { %18 = vsyncpa [#allocation4], 0  ;;  %s1051_s12 = smov [#allocation5]   ;;  %s63_s16 = sshll.u32 %s1157_s4, 4  ;;  %s64_s16 = int_to_ptr.hbm [resolvable:$true] %s63_s16 }
   0x5   :  { %s36_s13 = sshll.u32 %s1051_s12, 4  ;;  %s1052_s17 = smov 64   ;;  %s37_s13 = int_to_ptr.vmem [resolvable:$true] %s36_s13 }
   0x6   :  { %s1053_s18 = smov 4   ;;  %s1054_s19 = smov [#allocation8]  }
   0x7   :  { %42 = dma.hbm_to_vmem [thread:$0]  %s35_s11, 1024, %s37_s13, [#allocation6], %s1052_s17, %s1052_s17, %s1053_s18  }
   0x8   :  { %s65_s20 = sshll.u32 %s1054_s19, 4  ;;  %s24_s22 = sshll.u32 %s1153_s0, 4  ;;  %s66_s20 = int_to_ptr.vmem [resolvable:$true] %s65_s20  ;;  %s25_s22 = int_to_ptr.hbm [resolvable:$true] %s24_s22 }
   0x9   :  { %68 = dma.hbm_to_vmem [thread:$0]  %s64_s16, 16, %s66_s20, [#allocation9]  }
   0xa   :  { %s49_s4 = sshll.u32 %s1156_s3, 4  ;;  %s1055_s25 = smov [#allocation2]   ;;  %s50_s4 = int_to_ptr.hbm [resolvable:$true] %s49_s4 }
   0xb   :  { %s26_s26 = sshll.u32 %s1055_s25, 4  ;;  %s1056_s27 = smov [#allocation7]   ;;  %s27_s26 = int_to_ptr.vmem [resolvable:$true] %s26_s26 }
   0xc   :  { %29 = dma.hbm_to_vmem [thread:$0]  %s25_s22, 64, %s27_s26, [#allocation3]  }
   0xd   :  { %s51_s28 = sshll.u32 %s1056_s27, 4  ;;  %s73_s10 = sshll.u32 %s1158_s5, 4  ;;  %s52_s28 = int_to_ptr.vmem [resolvable:$true] %s51_s28  ;;  %s74_s10 = int_to_ptr.hbm [resolvable:$true] %s73_s10 }
   0xe   :  { %57 = dma.hbm_to_vmem [thread:$0]  %s50_s4, 1024, %s52_s28, [#allocation6], %s1052_s17, %s1052_s17, %s1053_s18  }
   0xf   :  { %s1057_s0 = smov [#allocation10]   ;;  %s88_s13 = sshll.u32 %s1160_s7, 4  ;;  %s89_s13 = int_to_ptr.hbm [resolvable:$true] %s88_s13 }
  0x10   :  { %s75_s11 = sshll.u32 %s1057_s0, 4  ;;  %s1058_s14 = smov 128   ;;  %s76_s11 = int_to_ptr.vmem [resolvable:$true] %s75_s11 }
  0x11   :  { %s1059_s15 = smov 8   ;;  %s1060_s16 = smov [#allocation11]  }
  0x12   :  { %81 = dma.hbm_to_vmem [thread:$0]  %s74_s10, 2048, %s76_s11, [#allocation9], %s1058_s14, %s1058_s14, %s1059_s15  }
  0x13   :  { %s90_s19 = sshll.u32 %s1060_s16, 4  ;;  %s91_s19 = int_to_ptr.vmem [resolvable:$true] %s90_s19 }
  0x14   :  { %96 = dma.hbm_to_vmem [thread:$0]  %s89_s13, 2048, %s91_s19, [#allocation12], %s1052_s17, %s1052_s17, %s1053_s18  }
  0x15   :  { %1041 = dma.done.wait [#allocation3], 64  }
  0x16   :  { %1042 = vsyncadd [#allocation3], 4294967232 }
  0x17   :  { %1043 = dma.done.wait [#allocation6], 2048  }
  0x18   :  { %1044 = vsyncadd [#allocation6], 4294965248 }
  0x19   :  { %1045 = dma.done.wait [#allocation9], 2064  }
  0x1a   :  { %1046 = vsyncadd [#allocation9], 4294965232 }
  0x1b   :  { %1047 = dma.done.wait [#allocation12], 2048  }
  0x1c   :  { %1048 = vsyncadd [#allocation12], 4294965248  ;;  %v814_v0 = vld [vmem:[#allocation5 + $0x38] sm:$0xff]  ;;  %v813_v1 = vld [vmem:[#allocation5 + $0x30] sm:$0xff]  ;;  %s602_s22 = sshll.u32 %s1162_s9, 4  ;;  %s603_s22 = int_to_ptr.hbm [resolvable:$true] %s602_s22 }
  0x1d   :  { %192 = vmatpush.bf16.msra.mxu0 %v814_v0  ;;  %v822_v2 = vld [vmem:[#allocation7 + $0x38] sm:$0xff]  ;;  %v821_v3 = vld [vmem:[#allocation7 + $0x30] sm:$0xff]  ;;  %v812_v4 = vld [vmem:[#allocation5 + $0x28] sm:$0xff] }
  0x1e   :  { %275 = vmatpush.bf16.msra.mxu1 %v822_v2  ;;  %v820_v5 = vld [vmem:[#allocation7 + $0x28] sm:$0xff]  ;;  %v811_v6 = vld [vmem:[#allocation5 + $0x20] sm:$0xff]  ;;  %v810_v8 = vld [vmem:[#allocation5 + $0x18] sm:$0xff] }
  0x1f   :  { %v819_v7 = vld [vmem:[#allocation7 + $0x20] sm:$0xff]  ;;  %v818_v9 = vld [vmem:[#allocation7 + $0x18] sm:$0xff]  ;;  %v809_v10 = vld [vmem:[#allocation5 + $0x10] sm:$0xff] }
  0x20   :  { %v817_v11 = vld [vmem:[#allocation7 + $0x10] sm:$0xff]  ;;  %v808_v12 = vld [vmem:[#allocation5 + $0x8] sm:$0xff]  ;;  %v807_v13 = vld [vmem:[#allocation5] sm:$0xff] }
  0x21   :  { %193 = vmatpush.bf16.msra.mxu0 %v813_v1  ;;  %v123_v14 = vld [vmem:[#allocation2] sm:$0xf]  ;;  %v816_v15 = vld [vmem:[#allocation7 + $0x8] sm:$0xff]  ;;  %v815_v16 = vld [vmem:[#allocation7] sm:$0xff] }
  0x22   :  { %276 = vmatpush.bf16.msra.mxu1 %v821_v3  ;;  %v737_v17 = vld [vmem:[#allocation10 + $0x70] sm:$0xf]  ;;  %v838_v18 = vld [vmem:[#allocation10 + $0x74] sm:$0xf0]  ;;  %v837_v19 = vld [vmem:[#allocation10 + $0x74] sm:$0xf] }
  0x23   :  { %v738_v20 = vor.u32 %v838_v18, %v737_v17  ;;  %v739_v21 = vld [vmem:[#allocation10 + $0x78] sm:$0xf0]  ;;  %v729_v22 = vld [vmem:[#allocation10 + $0x60] sm:$0xf]  ;;  %v836_v23 = vld [vmem:[#allocation10 + $0x64] sm:$0xf0] }
  0x24   :  { %v742_v24 = vor.u32 %v837_v19, %v739_v21  ;;  %v835_v25 = vld [vmem:[#allocation10 + $0x64] sm:$0xf]  ;;  %v731_v26 = vld [vmem:[#allocation10 + $0x68] sm:$0xf0]  ;;  %v730_v27 = vor.u32 %v836_v23, %v729_v22  ;;  %v721_v29 = vld [vmem:[#allocation10 + $0x50] sm:$0xf] }
  0x25   :  { %194 = vmatpush.bf16.msra.mxu0 %v812_v4  ;;  %392 = vmatpush.bf16.msra.mxu2 %v738_v20  ;;  %v734_v28 = vor.u32 %v835_v25, %v731_v26  ;;  %v834_v30 = vld [vmem:[#allocation10 + $0x54] sm:$0xf0]  ;;  %v833_v31 = vld [vmem:[#allocation10 + $0x54] sm:$0xf]  ;;  %v723_v32 = vld [vmem:[#allocation10 + $0x58] sm:$0xf0] }
  0x26   :  { %277 = vmatpush.bf16.msra.mxu1 %v820_v5  ;;  %405 = vmatpush.bf16.msra.mxu3 %v742_v24  ;;  %v722_v33 = vor.u32 %v834_v30, %v721_v29  ;;  %v726_v34 = vor.u32 %v833_v31, %v723_v32  ;;  %v713_v35 = vld [vmem:[#allocation10 + $0x40] sm:$0xf]  ;;  %v832_v36 = vld [vmem:[#allocation10 + $0x44] sm:$0xf0]  ;;  %v831_v37 = vld [vmem:[#allocation10 + $0x44] sm:$0xf] }
  0x27   :  { %v715_v38 = vld [vmem:[#allocation10 + $0x48] sm:$0xf0]  ;;  %v714_v39 = vor.u32 %v832_v36, %v713_v35  ;;  %v705_v41 = vld [vmem:[#allocation10 + $0x30] sm:$0xf]  ;;  %v830_v42 = vld [vmem:[#allocation10 + $0x34] sm:$0xf0] }
  0x28   :  { %v718_v40 = vor.u32 %v831_v37, %v715_v38  ;;  %v829_v43 = vld [vmem:[#allocation10 + $0x34] sm:$0xf]  ;;  %v707_v44 = vld [vmem:[#allocation10 + $0x38] sm:$0xf0]  ;;  %v706_v45 = vor.u32 %v830_v42, %v705_v41  ;;  %v697_v47 = vld [vmem:[#allocation10 + $0x20] sm:$0xf]  ;;  %v580_v42 = vlaneseq }
  0x29   :  { %195 = vmatpush.bf16.msra.mxu0 %v811_v6  ;;  %393 = vmatpush.bf16.msra.mxu2 %v730_v27  ;;  %v710_v46 = vor.u32 %v829_v43, %v707_v44  ;;  %v828_v48 = vld [vmem:[#allocation10 + $0x24] sm:$0xf0]  ;;  %v827_v49 = vld [vmem:[#allocation10 + $0x24] sm:$0xf]  ;;  %v699_v50 = vld [vmem:[#allocation10 + $0x28] sm:$0xf0] }
  0x2a   :  { %278 = vmatpush.bf16.msra.mxu1 %v819_v7  ;;  %406 = vmatpush.bf16.msra.mxu3 %v734_v28  ;;  %v698_v51 = vor.u32 %v828_v48, %v697_v47  ;;  %v702_v52 = vor.u32 %v827_v49, %v699_v50  ;;  %v866_v53 = vld [vmem:[%s1155_s2] ss:$0 sm:$0xff]  ;;  %v689_v59 = vld [vmem:[#allocation10 + $0x10] sm:$0xf]  ;;  %v825_v61 = vld [vmem:[#allocation10 + $0x14] sm:$0xf] }
  0x2b   :  { %v826_v60 = vld [vmem:[#allocation10 + $0x14] sm:$0xf0]  ;;  %v691_v63 = vld [vmem:[#allocation10 + $0x18] sm:$0xf0]  ;;  %v681_v1 = vld [vmem:[#allocation10] sm:$0xf] }
  0x2c   :  { %v690_v62 = vor.u32 %v826_v60, %v689_v59  ;;  %v694_v0 = vor.u32 %v825_v61, %v691_v63  ;;  %v824_v2 = vld [vmem:[#allocation10 + $0x4] sm:$0xf0]  ;;  %v823_v3 = vld [vmem:[#allocation10 + $0x4] sm:$0xf]  ;;  %v683_v5 = vld [vmem:[#allocation10 + $0x8] sm:$0xf0] }
  0x2d   :  { %196 = vmatpush.bf16.msra.mxu0 %v810_v8  ;;  %394 = vmatpush.bf16.msra.mxu2 %v722_v33  ;;  %v682_v4 = vor.u32 %v824_v2, %v681_v1  ;;  %v686_v6 = vor.u32 %v823_v3, %v683_v5  ;;  %v846_v7 = vld [vmem:[#allocation11 + $0x38] sm:$0xff]  ;;  %v841_v17 = vld [vmem:[#allocation11 + $0x10] sm:$0xff]  ;;  %v840_v25 = vld [vmem:[#allocation11 + $0x8] sm:$0xff]  ;;  %v581_v44 = vand.u32 127, %v580_v42 }
  0x2e   :  { %279 = vmatpush.bf16.msra.mxu1 %v818_v9  ;;  %407 = vmatpush.bf16.msra.mxu3 %v726_v34  ;;  %v854_v8 = vld [vmem:[#allocation11 + $0x78] sm:$0xff]  ;;  %v845_v9 = vld [vmem:[#allocation11 + $0x30] sm:$0xff]  ;;  %v848_v26 = vld [vmem:[#allocation11 + $0x48] sm:$0xff] }
  0x2f   :  { %v849_v18 = vld [vmem:[#allocation11 + $0x50] sm:$0xff]  ;;  %v867_v19 = vld [vmem:[#allocation8] ss:$0 sm:$0xff]  ;;  %v839_v27 = vld [vmem:[#allocation11] sm:$0xff]  ;;  %vm582_vm0 = vcmp.lt.s32.totalorder %v581_v44, 8 }
  0x30   :  { %v847_v28 = vld [vmem:[#allocation11 + $0x40] sm:$0xff]  ;;  %v306_v29 = vld [vmem:[%s1159_s6] sm:$0x3]  ;;  %s1061_s6 = smov [#allocation13]  }
  0x31   :  { %197 = vmatpush.bf16.msra.mxu0 %v809_v10  ;;  %395 = vmatpush.bf16.msra.mxu2 %v714_v39  ;;  %v853_v10 = vld [vmem:[#allocation11 + $0x70] sm:$0xff]  ;;  %v308_v30 = vperm.slane %v306_v29, 0  ;;  %v309_v31 = vperm.slane %v306_v29, 1  ;;  %v868_v43 = vld [vmem:[%s1161_s8] ss:$0 sm:$0xff]  ;;  %s600_s8 = sshll.u32 %s1061_s6, 4  ;;  %s601_s8 = int_to_ptr.vmem [resolvable:$true] %s600_s8 }
  0x32   :  { %280 = vmatpush.bf16.msra.mxu1 %v817_v11  ;;  %408 = vmatpush.bf16.msra.mxu3 %v718_v40  ;;  %v844_v11 = vld [vmem:[#allocation11 + $0x28] sm:$0xff] }
  0x35   :  { %198 = vmatpush.bf16.msra.mxu0 %v808_v12  ;;  %396 = vmatpush.bf16.msra.mxu2 %v706_v45  ;;  %v852_v12 = vld [vmem:[#allocation11 + $0x68] sm:$0xff] }
  0x36   :  { %281 = vmatpush.bf16.msra.mxu1 %v816_v15  ;;  %409 = vmatpush.bf16.msra.mxu3 %v710_v46  ;;  %v842_v15 = vld [vmem:[#allocation11 + $0x18] sm:$0xff] }
  0x39   :  { %199 = vmatpush.bf16.msra.mxu0 %v807_v13  ;;  %397 = vmatpush.bf16.msra.mxu2 %v698_v51  ;;  %v843_v13 = vld [vmem:[#allocation11 + $0x20] sm:$0xff] }
  0x3a   :  { %282 = vmatpush.bf16.msra.mxu1 %v815_v16  ;;  %410 = vmatpush.bf16.msra.mxu3 %v702_v52  ;;  %v850_v16 = vld [vmem:[#allocation11 + $0x58] sm:$0xff] }
  0x3c   :  { %200 = vmatmul.bf16.vlgmr.msra.gmra.mxu0 %v123_v14  ;;  %v851_v14 = vld [vmem:[#allocation11 + $0x60] sm:$0xff] }
  0x3d   :  { %398 = vmatpush.bf16.msra.mxu2 %v690_v62  ;;  %554 = vmatpush.bf16.msrb.mxu0 %v846_v7 }
  0x3e   :  { %411 = vmatpush.bf16.msra.mxu3 %v694_v0  ;;  %567 = vmatpush.bf16.msrb.mxu1 %v854_v8 }
  0x41   :  { %399 = vmatpush.bf16.msra.mxu2 %v682_v4  ;;  %555 = vmatpush.bf16.msrb.mxu0 %v845_v9 }
  0x42   :  { %412 = vmatpush.bf16.msra.mxu3 %v686_v6  ;;  %568 = vmatpush.bf16.msrb.mxu1 %v853_v10 }
  0x45   :  { %556 = vmatpush.bf16.msrb.mxu0 %v844_v11 }
  0x46   :  { %569 = vmatpush.bf16.msrb.mxu1 %v852_v12 }
  0x49   :  { %557 = vmatpush.bf16.msrb.mxu0 %v843_v13 }
  0x4a   :  { %570 = vmatpush.bf16.msrb.mxu1 %v851_v14 }
  0x4d   :  { %558 = vmatpush.bf16.msrb.mxu0 %v842_v15 }
  0x4e   :  { %571 = vmatpush.bf16.msrb.mxu1 %v850_v16 }
  0x51   :  { %559 = vmatpush.bf16.msrb.mxu0 %v841_v17 }
  0x52   :  { %572 = vmatpush.bf16.msrb.mxu1 %v849_v18 }
  0x55   :  { %560 = vmatpush.bf16.msrb.mxu0 %v840_v25 }
  0x56   :  { %573 = vmatpush.bf16.msrb.mxu1 %v848_v26 }
  0x59   :  { %561 = vmatpush.bf16.msrb.mxu0 %v839_v27 }
  0x5a   :  { %574 = vmatpush.bf16.msrb.mxu1 %v847_v28 }
  0xb9   :  { %v201_v54 = vpop.f32.mrf.mxu0 }
  0xba   :  { %v202_v55 = vadd.f32 %v866_v53, %v201_v54 }
  0xbc   :  { %v205_v56 = vmax.f32 %v202_v55, 0.0 }
  0xbe   :  { %v206_v57 = vpack.c.bf16 %v205_v56, %v205_v56 }
  0xc0   :  { %283 = vmatmul.bf16.vlgmr.msra.gmra.mxu1 %v206_v57 }
  0xc1   :  { %v203_v58 = vpop.f32.mrf.mxu0 }
 0x13d   :  { %v284_v20 = vpop.f32.mrf.mxu1 }
 0x13e   :  { %v285_v21 = vadd.f32 %v867_v19, %v284_v20 }
 0x140   :  { %v288_v22 = vmax.f32 %v285_v21, 0.0 }
 0x142   :  { %v289_v23 = vpack.c.bf16 %v288_v22, %v288_v22 }
 0x144   :  { %400 = vmatmul.bf16.vlgmr.msra.gmra.mxu2 %v289_v23  ;;  %413 = vmatmul.bf16.vlgmr.msra.gmra.mxu3 %v289_v23 }
 0x145   :  { %v286_v24 = vpop.f32.mrf.mxu1 }
 0x1c7   :  { %v401_v32 = vpop.f32.mrf.mxu2  ;;  %v414_v33 = vpop.f32.mrf.mxu3 }
 0x1c8   :  { %v402_v34 = vadd.f32 %v401_v32, %v308_v30  ;;  %v415_v35 = vadd.f32 %v414_v33, %v309_v31 }
 0x1ca   :  { %v418_v36 = vmax.f32 %v402_v34, 0.0  ;;  %v419_v37 = vmax.f32 %v415_v35, 0.0 }
 0x1cc   :  { %v420_v38 = vpack.c.bf16 %v418_v36, %v418_v36  ;;  %v421_v39 = vpack.c.bf16 %v419_v37, %v419_v37 }
 0x1ce   :  { %562 = vmatmul.bf16.vlgmr.msrb.gmra.mxu0 %v420_v38  ;;  %575 = vmatmul.bf16.vlgmr.msrb.gmra.mxu1 %v421_v39 }
 0x1cf   :  { %v403_v40 = vpop.f32.mrf.mxu2  ;;  %v416_v41 = vpop.f32.mrf.mxu3 }
 0x24b   :  { %v563_v45 = vpop.f32.mrf.mxu0  ;;  %v576_v46 = vpop.f32.mrf.mxu1 }
 0x24c   :  { %v564_v47 = vadd.f32 %v868_v43, %v563_v45 }
 0x24e   :  { %v577_v48 = vadd.f32 %v576_v46, %v564_v47 }
 0x250   :  { %v583_v49 = vsel %vm582_vm0, %v577_v48, -1e+30 }
 0x251   :  { %584 = vmax.xlane.f32.xlu0 %v583_v49 }
 0x253   :  { %v565_v50 = vpop.f32.mrf.mxu0  ;;  %v578_v51 = vpop.f32.mrf.mxu1 }
 0x2c4   :  { %v585_v52 = vpop.xlane.xlu0 %584 }
 0x2c5   :  { %v586_v53 = vsub.f32 %v583_v49, %v585_v52 }
 0x2c7   :  { %v587_v54 = vmul.f32 1.442695, %v586_v53 }
 0x2c9   :  { %869 = vpow2.f32 %v587_v54 }
 0x2cf   :  { %v870_v55 = vpop.eup %869 }
 0x2d0   :  { %589 = vadd.xlane.f32.xlu0 %v870_v55 }
 0x343   :  { %v590_v56 = vpop.xlane.xlu0 %589 }
 0x344   :  { %871 = vrcp.f32 %v590_v56 }
 0x34a   :  { %v872_v57 = vpop.eup %871 }
 0x34b   :  { %v592_v58 = vmul.f32 %v872_v57, %v870_v55 }
 0x34d   :  { %v593_v59 = vsel %vm582_vm0, %v592_v58, %v577_v48 }
 0x34e   :  { %594 = vst [vmem:[#allocation13] sm:$0xff] %v593_v59 }
 0x34f   :  { %605 = dma.vmem_to_hbm [thread:$0]  %s601_s8, 128, %s603_s22, [#allocation4]  }
 0x350   :  { %1049 = dma.done.wait [#allocation4], 128  }
 0x351   :  { %1050 = vsyncadd [#allocation4], 4294967168 }
 0x352   :  { %610 = vsyncpa [#allocation3], 1 }
 0x353   :  { %611 = vsyncpa [#allocation6], 1 }
 0x354   :  { %612 = vsyncpa [#allocation9], 1 }
 0x355   :  { %613 = vsyncpa [#allocation12], 1 }
 0x356   :  { %614 = vsyncpa [#allocation4], 1 }

</bundles_post_ra>
